<compile_context>
chip_gen: v7x
topology: tpu7x:2x2x1
jax: 0.10.0
libtpu: 0.0.40
codegen_flags: <defaults>
</compile_context>

<pallas_src>
import functools

import jax
import jax.numpy as jnp
from jax.experimental import pallas as pl
from jax.experimental.pallas import tpu as pltpu


def _round_up(x, m):
    return (x + m - 1) // m * m


def _mce_kernel(*refs, has_bias):
    """Grid = (batch_tiles, class_tiles); class axis is the reduction axis."""
    if has_bias:
        logits_ref, targets_ref, bias_ref, out_ref, m_sc, l_sc, t_sc = refs
    else:
        logits_ref, targets_ref, out_ref, m_sc, l_sc, t_sc = refs

    k = pl.program_id(1)

    @pl.when(k == 0)
    def _init():
        m_sc[...] = jnp.full_like(m_sc, -jnp.inf)   # running max
        l_sc[...] = jnp.zeros_like(l_sc)            # running sum of exp
        t_sc[...] = jnp.zeros_like(t_sc)            # target logit

    x = logits_ref[...].astype(jnp.float32)         # [TB, TC] (cast per tile)
    if has_bias:
        x = x + bias_ref[...]                       # [1, TC] broadcast add

    tc = x.shape[1]
    tgt = targets_ref[...]                          # [TB, 1] int32
    col = jax.lax.broadcasted_iota(jnp.int32, x.shape, 1) + k * tc
    is_tgt = col == tgt                             # [TB, TC]
    # Target column lives in exactly one class tile; other tiles add 0.
    t_sc[...] += jnp.sum(jnp.where(is_tgt, x, 0.0), axis=-1, keepdims=True)

    # Online (flash-style) log-sum-exp over the class tiles.
    m_prev = m_sc[...]
    m_new = jnp.maximum(m_prev, jnp.max(x, axis=-1, keepdims=True))
    l_sc[...] = (jnp.exp(m_prev - m_new) * l_sc[...]
                 + jnp.sum(jnp.exp(x - m_new), axis=-1, keepdims=True))
    m_sc[...] = m_new

    @pl.when(k == pl.num_programs(1) - 1)
    def _finalize():
        # loss = logsumexp(restricted logits) - logit[target]
        out_ref[...] = m_sc[...] + jnp.log(l_sc[...]) - t_sc[...]


# Bytes budgeted for the double-buffered logits tile (fits v5e's 16 MiB
# scoped-VMEM default with headroom; v6e/v7x have more).
_VMEM_LOGITS_BUDGET = 12 * 1024 * 1024


def _tile_sizes(batch, num_classes, itemsize, c_tile):
    if c_tile is None:
        # Keep the whole class axis in one tile whenever even the minimal
        # 8-row tile fits the budget; otherwise tile the vocab.
        if 2 * 8 * num_classes * itemsize <= _VMEM_LOGITS_BUDGET:
            c_tile = num_classes
        else:
            c_tile = 4096                      # lane-dense, multiple of 128
    else:
        c_tile = min(c_tile, num_classes)
    if c_tile != num_classes and c_tile % 128 != 0:
        raise ValueError("c_tile must be a multiple of 128 (or cover all classes)")
    tb = _VMEM_LOGITS_BUDGET // (2 * c_tile * itemsize)
    tb = max(8, min(512, (tb // 8) * 8))
    tb = min(tb, _round_up(batch, 8))          # don't over-pad small batches
    return tb, c_tile


def masked_cross_entropy(logits, targets, active_classes=None, reduction="mean",
                         *, c_tile=None):
    """Pallas-TPU equivalent of MaskedCrossEntropy.forward."""
    assert reduction in ("none", "sum", "mean")
    B, C = logits.shape
    itemsize = jnp.dtype(logits.dtype).itemsize
    tb, c_tile = _tile_sizes(B, C, itemsize, c_tile)

    B_pad = _round_up(_round_up(B, 8), tb)
    C_pad = _round_up(C, c_tile) if c_tile != C else C

    # Bias is only needed when classes are restricted or the class axis is
    # padded; otherwise the kernel specializes away all masking work.
    need_bias = (active_classes is not None) or (C_pad != C)

    if B_pad != B or C_pad != C:
        logits = jnp.pad(logits, ((0, B_pad - B), (0, C_pad - C)))
    tgt = jnp.zeros((B_pad,), jnp.int32).at[:B].set(targets.astype(jnp.int32))
    tgt = tgt.reshape(B_pad, 1)

    in_specs = [
        pl.BlockSpec((tb, c_tile), lambda i, k: (i, k)),   # logits (native dtype)
        pl.BlockSpec((tb, 1), lambda i, k: (i, 0)),        # targets
    ]
    args = [logits, tgt]

    if need_bias:
        if active_classes is not None:
            ac = jnp.asarray(active_classes, dtype=jnp.int32)
            bias = jnp.full((C_pad,), -1e30, jnp.float32).at[ac].set(0.0)
        else:
            bias = jnp.zeros((C_pad,), jnp.float32).at[C:].set(-1e30)
        args.append(bias.reshape(1, C_pad))
        in_specs.append(pl.BlockSpec((1, c_tile), lambda i, k: (0, k)))

    grid = (B_pad // tb, C_pad // c_tile)

    # TODO(synk): optionally sweep pipeline_mode=pl.Buffered(3) on the logits
    # BlockSpec for small batch tiles if a profile shows exposed DMA.
    out = pl.pallas_call(
        functools.partial(_mce_kernel, has_bias=need_bias),
        out_shape=jax.ShapeDtypeStruct((B_pad, 1), jnp.float32),
        grid=grid,
        in_specs=in_specs,
        out_specs=pl.BlockSpec((tb, 1), lambda i, k: (i, 0)),
        scratch_shapes=[pltpu.VMEM((tb, 1), jnp.float32)] * 3,
        compiler_params=pltpu.CompilerParams(
            dimension_semantics=("parallel", "arbitrary")),
    )(*args)

    losses = out[:B, 0]                 # per-sample NLL, padding discarded
    if reduction == "none":
        return losses
    if reduction == "sum":
        return jnp.sum(losses)
    return jnp.mean(losses)


def _reference(logits, targets, active_classes=None, reduction="mean"):
    """Pure-JAX reference mirroring the PyTorch module."""
    B, C = logits.shape
    logits = logits.astype(jnp.float32)
    if active_classes is None:
        mask = jnp.ones((C,), bool)
    else:
        ac = jnp.asarray(active_classes, dtype=jnp.int32)
        mask = jnp.zeros((C,), bool).at[ac].set(True)
    masked = jnp.where(mask[None, :], logits, -jnp.inf)
    logp = jax.nn.log_softmax(masked, axis=-1)
    nll = -logp[jnp.arange(B), targets]
    if reduction == "none":
        return nll
    if reduction == "sum":
        return jnp.sum(nll)
    return jnp.mean(nll)


if __name__ == "__main__":
    key = jax.random.PRNGKey(0)
    k_logits, k_tidx, k_t2 = jax.random.split(key, 3)

    B, C = 8, 256
    active_classes = [1, 3, 5, 7, 11, 13, 17, 19, 23, 29, 101, 200, 255]
    ac = jnp.asarray(active_classes, dtype=jnp.int32)

    logits = jax.random.normal(k_logits, (B, C), dtype=jnp.float32)
    tidx = jax.random.randint(k_tidx, (B,), 0, len(active_classes))
    targets = ac[tidx]                                   # targets in active set
    targets_any = jax.random.randint(k_t2, (B,), 0, C)   # for the unmasked path

    def check(got, want, atol=1e-5, rtol=1e-5):
        got = jax.block_until_ready(got)
        return bool(jnp.allclose(got, want, atol=atol, rtol=rtol))

    ok = True
    for reduction in ("mean", "sum", "none"):
        # masked path, single class tile
        ok &= check(masked_cross_entropy(logits, targets, active_classes, reduction),
                    _reference(logits, targets, active_classes, reduction))
        # standard cross-entropy path (active_classes=None, no bias input)
        ok &= check(masked_cross_entropy(logits, targets_any, None, reduction),
                    _reference(logits, targets_any, None, reduction))
        # class-tiled path (online log-sum-exp across two class tiles)
        ok &= check(masked_cross_entropy(logits, targets, active_classes, reduction,
                                         c_tile=128),
                    _reference(logits, targets, active_classes, reduction))
        ok &= check(masked_cross_entropy(logits, targets_any, None, reduction,
                                         c_tile=128),
                    _reference(logits, targets_any, None, reduction))

    # bf16 logits stay bf16 in HBM; the cast to f32 happens per tile in-kernel.
    logits_bf16 = logits.astype(jnp.bfloat16)
    ok &= check(masked_cross_entropy(logits_bf16, targets, active_classes, "mean"),
                _reference(logits_bf16.astype(jnp.float32), targets,
                           active_classes, "mean"),
                atol=1e-4, rtol=1e-4)

    # batch not a multiple of the sublane width (exercises batch padding)
    B2 = 6
    l2 = jax.random.normal(jax.random.PRNGKey(1), (B2, C), dtype=jnp.float32)
    t2 = ac[jax.random.randint(jax.random.PRNGKey(2), (B2,), 0, len(active_classes))]
    ok &= check(masked_cross_entropy(l2, t2, active_classes, "none"),
                _reference(l2, t2, active_classes, "none"))
    ok &= check(masked_cross_entropy(l2, t2, active_classes, "mean"),
                _reference(l2, t2, active_classes, "mean"))

    if not ok:
        raise AssertionError("Pallas kernel does not match reference")
    print("KERNEL_OK")
</pallas_src>

<mosaic_0001>
module attributes {stable_mosaic.version = 11 : i64} {
  func.func @_mce_kernel(%arg0: i32, %arg1: i32, %arg2: memref<8x256xf32, #tpu.memory_space<vmem>>, %arg3: memref<8x1xi32, #tpu.memory_space<vmem>>, %arg4: memref<1x256xf32, #tpu.memory_space<vmem>>, %arg5: memref<8x1xf32, #tpu.memory_space<vmem>>, %arg6: memref<8x1xf32, #tpu.memory_space<vmem>>, %arg7: memref<8x1xf32, #tpu.memory_space<vmem>>, %arg8: memref<8x1xf32, #tpu.memory_space<vmem>>) attributes {dimension_semantics = [#tpu.dimension_semantics<parallel>, #tpu.dimension_semantics<arbitrary>], iteration_bounds = array<i64: 1, 1>, scalar_prefetch = 0 : i64, scratch_operands = 3 : i64, tpu.core_type = #tpu.core_type<tc>, window_params = [{transform_indices = @transform_0, window_bounds = array<i64: 8, 256>}, {transform_indices = @transform_1, window_bounds = array<i64: 8, 1>}, {transform_indices = @transform_2, window_bounds = array<i64: 1, 256>}, {transform_indices = @transform_3, window_bounds = array<i64: 8, 1>}]} {
    %c0_i32 = arith.constant 0 : i32
    %0 = arith.cmpi eq, %arg1, %c0_i32 : i32
    %1 = arith.extui %0 : i1 to i32
    %c0_i32_0 = arith.constant 0 : i32
    %2 = arith.cmpi ne, %1, %c0_i32_0 : i32
    scf.if %2 {
      %cst_23 = arith.constant 0xFF800000 : f32
      %40 = vector.broadcast %cst_23 : f32 to vector<8x1xf32>
      %c0_24 = arith.constant 0 : index
      %c0_25 = arith.constant 0 : index
      %41 = vector.load %arg6[%c0_24, %c0_25] : memref<8x1xf32, #tpu.memory_space<vmem>>, vector<8x1xf32>
      tpu.vector_store %arg6[%c0_24, %c0_25], %40 {strides = array<i32>} : memref<8x1xf32, #tpu.memory_space<vmem>>, vector<8x1xf32>,
      %cst_26 = arith.constant 0.000000e+00 : f32
      %42 = vector.broadcast %cst_26 : f32 to vector<8x1xf32>
      %c0_27 = arith.constant 0 : index
      %c0_28 = arith.constant 0 : index
      %43 = vector.load %arg7[%c0_27, %c0_28] : memref<8x1xf32, #tpu.memory_space<vmem>>, vector<8x1xf32>
      tpu.vector_store %arg7[%c0_27, %c0_28], %42 {strides = array<i32>} : memref<8x1xf32, #tpu.memory_space<vmem>>, vector<8x1xf32>,
      %cst_29 = arith.constant 0.000000e+00 : f32
      %44 = vector.broadcast %cst_29 : f32 to vector<8x1xf32>
      %c0_30 = arith.constant 0 : index
      %c0_31 = arith.constant 0 : index
      %45 = vector.load %arg8[%c0_30, %c0_31] : memref<8x1xf32, #tpu.memory_space<vmem>>, vector<8x1xf32>
      tpu.vector_store %arg8[%c0_30, %c0_31], %44 {strides = array<i32>} : memref<8x1xf32, #tpu.memory_space<vmem>>, vector<8x1xf32>,
    } else {
    }
    %c0 = arith.constant 0 : index
    %c0_1 = arith.constant 0 : index
    %3 = vector.load %arg2[%c0, %c0_1] : memref<8x256xf32, #tpu.memory_space<vmem>>, vector<8x256xf32>
    %c0_2 = arith.constant 0 : index
    %c0_3 = arith.constant 0 : index
    %4 = vector.load %arg4[%c0_2, %c0_3] : memref<1x256xf32, #tpu.memory_space<vmem>>, vector<1x256xf32>
    %5 = vector.broadcast %4 : vector<1x256xf32> to vector<8x256xf32>
    %6 = arith.addf %3, %5 : vector<8x256xf32>
    %c0_4 = arith.constant 0 : index
    %c0_5 = arith.constant 0 : index
    %7 = vector.load %arg3[%c0_4, %c0_5] : memref<8x1xi32, #tpu.memory_space<vmem>>, vector<8x1xi32>
    %8 = tpu.iota {dimensions = array<i32: 1>} : vector<8x256xi32>
    %c256_i32 = arith.constant 256 : i32
    %9 = arith.muli %arg1, %c256_i32 : i32
    %10 = vector.broadcast %9 : i32 to vector<8x256xi32>
    %11 = arith.addi %8, %10 : vector<8x256xi32>
    %12 = vector.broadcast %7 : vector<8x1xi32> to vector<8x256xi32>
    %13 = arith.cmpi eq, %11, %12 : vector<8x256xi32>
    %c0_6 = arith.constant 0 : index
    %c0_7 = arith.constant 0 : index
    %14 = vector.load %arg8[%c0_6, %c0_7] : memref<8x1xf32, #tpu.memory_space<vmem>>, vector<8x1xf32>
    %cst = arith.constant 0.000000e+00 : f32
    %15 = vector.broadcast %cst : f32 to vector<8x256xf32>
    %16 = arith.select %13, %6, %15 : vector<8x256xi1>, vector<8x256xf32>
    %cst_8 = arith.constant dense<0.000000e+00> : vector<8xf32>
    %17 = vector.multi_reduction <add>, %16, %cst_8 [1] : vector<8x256xf32> to vector<8xf32>
    %18 = vector.shape_cast %17 : vector<8xf32> to vector<8x1xf32>
    %19 = arith.addf %14, %18 : vector<8x1xf32>
    %c0_9 = arith.constant 0 : index
    %c0_10 = arith.constant 0 : index
    %20 = vector.load %arg8[%c0_9, %c0_10] : memref<8x1xf32, #tpu.memory_space<vmem>>, vector<8x1xf32>
    tpu.vector_store %arg8[%c0_9, %c0_10], %19 {strides = array<i32>} : memref<8x1xf32, #tpu.memory_space<vmem>>, vector<8x1xf32>,
    %c0_11 = arith.constant 0 : index
    %c0_12 = arith.constant 0 : index
    %21 = vector.load %arg6[%c0_11, %c0_12] : memref<8x1xf32, #tpu.memory_space<vmem>>, vector<8x1xf32>
    %cst_13 = arith.constant dense<0xFF800000> : vector<8xf32>
    %22 = vector.multi_reduction <maximumf>, %6, %cst_13 [1] : vector<8x256xf32> to vector<8xf32>
    %23 = vector.shape_cast %22 : vector<8xf32> to vector<8x1xf32>
    %24 = arith.maximumf %21, %23 : vector<8x1xf32>
    %25 = arith.subf %21, %24 : vector<8x1xf32>
    %26 = math.exp %25 : vector<8x1xf32>
    %c0_14 = arith.constant 0 : index
    %c0_15 = arith.constant 0 : index
    %27 = vector.load %arg7[%c0_14, %c0_15] : memref<8x1xf32, #tpu.memory_space<vmem>>, vector<8x1xf32>
    %28 = arith.mulf %26, %27 : vector<8x1xf32>
    %29 = vector.broadcast %24 : vector<8x1xf32> to vector<8x256xf32>
    %30 = arith.subf %6, %29 : vector<8x256xf32>
    %31 = math.exp %30 : vector<8x256xf32>
    %cst_16 = arith.constant dense<0.000000e+00> : vector<8xf32>
    %32 = vector.multi_reduction <add>, %31, %cst_16 [1] : vector<8x256xf32> to vector<8xf32>
    %33 = vector.shape_cast %32 : vector<8xf32> to vector<8x1xf32>
    %34 = arith.addf %28, %33 : vector<8x1xf32>
    %c0_17 = arith.constant 0 : index
    %c0_18 = arith.constant 0 : index
    %35 = vector.load %arg7[%c0_17, %c0_18] : memref<8x1xf32, #tpu.memory_space<vmem>>, vector<8x1xf32>
    tpu.vector_store %arg7[%c0_17, %c0_18], %34 {strides = array<i32>} : memref<8x1xf32, #tpu.memory_space<vmem>>, vector<8x1xf32>,
    %c0_19 = arith.constant 0 : index
    %c0_20 = arith.constant 0 : index
    %36 = vector.load %arg6[%c0_19, %c0_20] : memref<8x1xf32, #tpu.memory_space<vmem>>, vector<8x1xf32>
    tpu.vector_store %arg6[%c0_19, %c0_20], %24 {strides = array<i32>} : memref<8x1xf32, #tpu.memory_space<vmem>>, vector<8x1xf32>,
    %c0_i32_21 = arith.constant 0 : i32
    %37 = arith.cmpi eq, %arg1, %c0_i32_21 : i32
    %38 = arith.extui %37 : i1 to i32
    %c0_i32_22 = arith.constant 0 : i32
    %39 = arith.cmpi ne, %38, %c0_i32_22 : i32
    scf.if %39 {
      %c0_23 = arith.constant 0 : index
      %c0_24 = arith.constant 0 : index
      %40 = vector.load %arg6[%c0_23, %c0_24] : memref<8x1xf32, #tpu.memory_space<vmem>>, vector<8x1xf32>
      %c0_25 = arith.constant 0 : index
      %c0_26 = arith.constant 0 : index
      %41 = vector.load %arg7[%c0_25, %c0_26] : memref<8x1xf32, #tpu.memory_space<vmem>>, vector<8x1xf32>
      %42 = math.log %41 : vector<8x1xf32>
      %43 = arith.addf %40, %42 : vector<8x1xf32>
      %c0_27 = arith.constant 0 : index
      %c0_28 = arith.constant 0 : index
      %44 = vector.load %arg8[%c0_27, %c0_28] : memref<8x1xf32, #tpu.memory_space<vmem>>, vector<8x1xf32>
      %45 = arith.subf %43, %44 : vector<8x1xf32>
      %c0_29 = arith.constant 0 : index
      %c0_30 = arith.constant 0 : index
      %46 = vector.load %arg5[%c0_29, %c0_30] : memref<8x1xf32, #tpu.memory_space<vmem>>, vector<8x1xf32>
      tpu.vector_store %arg5[%c0_29, %c0_30], %45 {strides = array<i32>} : memref<8x1xf32, #tpu.memory_space<vmem>>, vector<8x1xf32>,
    } else {
    }
    return
  }
  func.func @transform_0(%arg0: i32, %arg1: i32) -> (i32, i32) {
    %c0_i32 = arith.constant 0 : i32
    return %arg0, %arg1 : i32, i32
  }
  func.func @transform_1(%arg0: i32, %arg1: i32) -> (i32, i32) {
    %c0_i32 = arith.constant 0 : i32
    %c0_i32_0 = arith.constant 0 : i32
    return %arg0, %c0_i32 : i32, i32
  }
  func.func @transform_2(%arg0: i32, %arg1: i32) -> (i32, i32) {
    %c0_i32 = arith.constant 0 : i32
    %c0_i32_0 = arith.constant 0 : i32
    return %c0_i32, %arg1 : i32, i32
  }
  func.func @transform_3(%arg0: i32, %arg1: i32) -> (i32, i32) {
    %c0_i32 = arith.constant 0 : i32
    %c0_i32_0 = arith.constant 0 : i32
    return %arg0, %c0_i32 : i32, i32
  }
}

</mosaic_0001>

<bundles_post_ra>
// kernel: tpu_custom_call.1
= control target key start
LH: loop header
LB: loop body
LE: loop exit
PB: predicated region body
PF: predicated region fallthrough
CT: control target
= control target key end

     0   :  { %8 = vsyncpa [#allocation6], 0  ;;  %s153_s12 = smov [#allocation5]   ;;  %s205_s0 = inlined_call_operand.hbm [shape: f32[8,256], index: 0, kind: input, shape index: {}]   ;;  %s206_s1 = inlined_call_operand.vmem [shape: s32[8,1], index: 1, kind: input, shape index: {}]   ;;  %s207_s2 = inlined_call_operand.vmem [shape: f32[1,256], index: 2, kind: input, shape index: {}]   ;;  %s208_s3 = inlined_call_operand.vmem [shape: f32[8,1], index: 3, kind: output, shape index: {}]  }
   0x1   :  { %s15_s13 = sshll.u32 %s153_s12, 4  ;;  %s129_s16 = scalar_lea.hbm %s205_s0, 256  ;;  %s16_s13 = int_to_ptr.vmem [resolvable:$true] %s15_s13 }
   0x2   :  { %p130_p0 = scmp.ne.s32.totalorder %s205_s0, %s129_s16  ;;  %p133_p1 = scmp.lt.u32.totalorder %s129_s16, %s205_s0 }
   0x4   :  { %p135_p2 = pnand %p133_p1, %p130_p0 }
   0x6   :  { %138 = shalt.err (!%p135_p2)
}
   0x7   :  { %s139_s21 = scalar_lea.vmem %s16_s13, 256  ;;  %p144_p4 = scmp.lt.s32.totalorder %s16_s13, %s16_s13 }
   0x8   :  { %p140_p3 = scmp.ne.s32.totalorder %s16_s13, %s139_s21  ;;  %p145_p5 = scmp.lt.s32.totalorder %s139_s21, %s139_s21 }
   0xa   :  { %p146_p6 = por %p145_p5, %p144_p4 }
   0xc   :  { %p147_p7 = pnand %p146_p6, %p140_p3 }
   0xe   :  { %150 = shalt.err (!%p147_p7)
}
   0xf   :  { %18 = dma.hbm_to_vmem [thread:$0]  %s205_s0, 256, %s16_s13, [#allocation6]  }
  0x10   :  { %151 = dma.done.wait [#allocation6], 256  }
  0x11   :  { %152 = vsyncadd [#allocation6], 4294967040  ;;  %v38_v0 = vlaneseq  ;;  %vm30_vm0 = vcmask 7168   ;;  %v154_v1 = vmov -inf   ;;  %v34_v5 = vld [vmem:[#allocation5] sm:$0xff]  ;;  %v35_v6 = vld [vmem:[#allocation5 + $0x8] sm:$0xff] }
  0x12   :  { %31 = vst.msk [vmem:[#allocation2] sm:$0xff] %vm30_vm0, %v154_v1  ;;  %v36_v7 = vld [vmem:[%s207_s2] sm:$0x3]  ;;  %v155_v13 = vmov 0   ;;  %v156_v15 = vmov 0.0  }
  0x13   :  { %v39_v2 = vshrl.u32 %v38_v0, 7  ;;  %119 = vset.pattern.permute.xlu0 %v155_v13  ;;  %120 = vset.pattern.permute.xlu1 %v155_v13  ;;  %v50_v14 = vld [vmem:[%s206_s1] sm:$0xff]  ;;  %32 = vst.msk [vmem:[#allocation3] sm:$0xff] %vm30_vm0, %v156_v15  ;;  %33 = vst.msk [vmem:[#allocation4] sm:$0xff] %vm30_vm0, %v156_v15  ;;  %v52_v25 = vand.u32 127, %v38_v0 }
  0x14   :  { %59 = vperm.xlu1 %120, %v50_v14  }
  0x15   :  { %v40_v3 = vsub.s32 0, %v39_v2  ;;  %v44_v4 = vsub.s32 1, %v39_v2  ;;  %v53_v26 = vadd.s32 128, %v52_v25 }
  0x17   :  { %v41_v8 = vrot.slane %v36_v7, %v40_v3  ;;  %v45_v9 = vrot.slane %v36_v7, %v44_v4 }
  0x19   :  { %v48_v10 = vadd.f32 %v41_v8, %v34_v5  ;;  %v49_v11 = vadd.f32 %v45_v9, %v35_v6  ;;  %v72_v16 = vld [vmem:[#allocation2] sm:$0xff] }
  0x1a   :  { %v80_v36 = vld [vmem:[#allocation3] sm:$0xff]  ;;  %v63_v40 = vld [vmem:[#allocation4] sm:$0xff] }
  0x1b   :  { %v73_v12 = vmax.f32 %v48_v10, %v49_v11 }
  0x1d   :  { %74 = vmax.xlane.f32.xlu0 %v73_v12 }
  0x93   :  { %v60_v27 = vpop.permute.xlu1 %59 }
  0x94   :  { %vm61_vm1 = vcmp.eq.s32.totalorder %v52_v25, %v60_v27  ;;  %vm62_vm2 = vcmp.eq.s32.totalorder %v53_v26, %v60_v27 }
  0x95   :  { %v64_v30 = vsel %vm61_vm1, %v48_v10, 0.0  ;;  %v65_v31 = vsel %vm62_vm2, %v49_v11, 0.0 }
  0x96   :  { %v66_v33 = vadd.f32 %v65_v31, %v64_v30 }
  0xaa   :  { %v75_v17 = vpop.xlane.xlu0 %74 }
  0xab   :  { %v76_v18 = vmax.f32 %v72_v16, %v75_v17 }
  0xad   :  { %v77_v19 = vsub.f32 %v72_v16, %v76_v18  ;;  %98 = vst.msk [vmem:[#allocation2] sm:$0xff] %vm30_vm0, %v76_v18  ;;  %84 = vperm.xlu0 %119, %v76_v18  }
  0xaf   :  { %v78_v34 = vmul.f32 1.442695, %v77_v19 }
  0xb4   :  { %v102_v46 = vld [vmem:[#allocation2] sm:$0xff] }
 0x12c   :  { %v85_v20 = vpop.permute.xlu0 %84 }
 0x12d   :  { %v87_v21 = vsub.f32 %v48_v10, %v85_v20  ;;  %v88_v22 = vsub.f32 %v49_v11, %v85_v20 }
 0x12f   :  { %v89_v23 = vmul.f32 1.442695, %v87_v21  ;;  %v91_v24 = vmul.f32 1.442695, %v88_v22 }
 0x131   :  { %121 = vpow2.f32 %v89_v23 }
 0x132   :  { %123 = vpow2.f32 %v91_v24 }
 0x133   :  { %125 = vpow2.f32 %v78_v34 }
 0x13b   :  { %v122_v28 = vpop.eup %121 }
 0x13c   :  { %v124_v29 = vpop.eup %123 }
 0x13d   :  { %v93_v32 = vadd.f32 %v124_v29, %v122_v28  ;;  %v126_v35 = vpop.eup %125 }
 0x13e   :  { %v81_v37 = vmul.f32 %v126_v35, %v80_v36 }
 0x13f   :  { %94 = vadd.xlane.f32.xlu1 %v93_v32 }
 0x143   :  { %67 = vadd.xlane.f32.xlu1 %v66_v33 }
 0x1cc   :  { %v95_v38 = vpop.xlane.xlu1 %94 }
 0x1cd   :  { %v96_v39 = vadd.f32 %v95_v38, %v81_v37 }
 0x1cf   :  { %97 = vst.msk [vmem:[#allocation3] sm:$0xff] %vm30_vm0, %v96_v39 }
 0x1d0   :  { %v68_v41 = vpop.xlane.xlu1 %67 }
 0x1d1   :  { %v69_v42 = vadd.f32 %v68_v41, %v63_v40 }
 0x1d3   :  { %71 = vst.msk [vmem:[#allocation4] sm:$0xff] %vm30_vm0, %v69_v42 }
 0x1d6   :  { %v103_v43 = vld [vmem:[#allocation3] sm:$0xff] }
 0x1d7   :  { %127 = vlog2.f32 %v103_v43 }
 0x1da   :  { %v107_v47 = vld [vmem:[#allocation4] sm:$0xff] }
 0x1e1   :  { %v128_v44 = vpop.eup %127 }
 0x1e2   :  { %v105_v45 = vmul.f32 0.6931472, %v128_v44 }
 0x1e4   :  { %v106_v48 = vadd.f32 %v105_v45, %v102_v46 }
 0x1e6   :  { %v108_v49 = vsub.f32 %v106_v48, %v107_v47 }
 0x1e8   :  { %109 = vst.msk [vmem:[%s208_s3] sm:$0xff] %vm30_vm0, %v108_v49 }
 0x1e9   :  { %114 = vsyncpa [#allocation6], 1 }

</bundles_post_ra>
